<compile_context>
chip_gen: v6e
topology: v6e:2x2x1
jax: 0.10.0
libtpu: 0.0.40
codegen_flags: <defaults>
</compile_context>

<pallas_src>
from types import SimpleNamespace

import jax
import jax.numpy as jnp
from jax.experimental import pallas as pl
from jax.experimental.pallas import tpu as pltpu

C_FEAT = 32  # shared feature dim produced by net_sound / net_frame (K channels)


def _pick_tile(n, max_tile):
    """Largest tile <= max_tile that is a multiple of 128 and divides n.
    Falls back to the full extent (always legal as a block dim) otherwise."""
    if n <= max_tile:
        return n
    t = (max_tile // 128) * 128
    while t >= 128:
        if n % t == 0:
            return t
        t -= 128
    return n


# ---------------------------------------------------------------------------
# Kernel 1: net_frame stand-in  ==  per-pixel linear RGB(3) -> C_FEAT, sigmoid
# (img_activation == 'sigmoid'), then mean over the frame/time axis (dim=2).
# Lane-dense layout: pixels (HW) on lanes, channels on sublanes.
# ---------------------------------------------------------------------------
def _frame_kernel(x_ref, w_ref, b_ref, out_ref, acc_ref):
    # x_ref: (1, 1, Cin, THW)  w_ref: (C, Cin)  b_ref: (C, 1)
    # out_ref: (1, C, THW)     acc_ref: (C, THW) f32 mean accumulator
    t = pl.program_id(2)

    @pl.when(t == 0)
    def _():
        acc_ref[...] = jnp.zeros_like(acc_ref)

    x = x_ref[0, 0]                           # (Cin, THW)
    w = w_ref[...]                            # (C, Cin)
    y = b_ref[...]                            # (C, 1) -> broadcasts to (C, THW)
    for c in range(w_ref.shape[1]):           # tiny static contraction (Cin == 3)
        y = y + w[:, c:c + 1] * x[c:c + 1, :]
    acc_ref[...] += jax.nn.sigmoid(y)         # img_activation == 'sigmoid' (f32)

    @pl.when(t == pl.num_programs(2) - 1)
    def _():
        out_ref[0] = acc_ref[...] / pl.num_programs(2)   # mean over frames (dim=2)


def net_frame_forward(frames_tensor, w, b, *, hw_tile_max=4096):
    # frames_tensor: (B, Cin, Tf, H, W) -> frame-averaged features (B, C, H*W)
    B, Cin, Tf, H, W = frames_tensor.shape
    C = w.shape[0]
    HW = H * W
    THW = _pick_tile(HW, hw_tile_max)
    n_hw = HW // THW
    # NCTHW -> (B, Tf, Cin, HW): pixels go to lanes, channels stay small.
    x = jnp.transpose(frames_tensor, (0, 2, 1, 3, 4)).reshape(B, Tf, Cin, HW)
    out = pl.pallas_call(
        _frame_kernel,
        out_shape=jax.ShapeDtypeStruct((B, C, HW), jnp.float32),
        grid_spec=pltpu.PrefetchScalarGridSpec(
            num_scalar_prefetch=0,
            grid=(B, n_hw, Tf),                       # reduction (Tf) innermost
            in_specs=[
                pl.BlockSpec((1, 1, Cin, THW), lambda b_, h_, t_: (b_, t_, 0, h_)),
                pl.BlockSpec((C, Cin), lambda b_, h_, t_: (0, 0)),
                pl.BlockSpec((C, 1), lambda b_, h_, t_: (0, 0)),
            ],
            out_specs=pl.BlockSpec((1, C, THW), lambda b_, h_, t_: (b_, 0, h_)),
            scratch_shapes=[pltpu.VMEM((C, THW), jnp.float32)],
        ),
        compiler_params=pltpu.CompilerParams(
            dimension_semantics=("parallel", "parallel", "arbitrary")
        ),
    )(x, w, b)
    return out  # (B, C, HW) -- already frame-averaged, lane-dense in HW


# ---------------------------------------------------------------------------
# Kernel 2: fused net_sound + synthesizer.forward_pixelwise
#   feat_sound = w * log(mag + 1e-10) + b            (activation 'no')
#   pred       = scale * (img_flat @ feat_sound) + bias
# Tiled along the FT axis; the big (HW, TN) output write is lane-dense.
# ---------------------------------------------------------------------------
def _synth_kernel(scale_ref, bias_ref, mag_ref, sw_ref, sb_ref, img_ref,
                  pred_ref, snd_ref):
    # scale_ref/bias_ref: (1,) f32 in SMEM
    # mag_ref: (1, 1, TN); sw_ref/sb_ref: (C, 1); img_ref: (1, C, HW)
    # pred_ref: (1, HW, TN); snd_ref: (1, C, TN)

    # --- fused net_sound (kept in f32) ---
    lm = jnp.log(mag_ref[0] + 1e-10)                       # (1, TN)
    feat = sw_ref[...] * lm + sb_ref[...]                  # (C, TN)
    snd_ref[0] = feat                                      # feat_sound output (f32)

    # --- InnerProd synthesizer on the MXU ---
    scale = scale_ref[0]
    bias = bias_ref[0]
    img_hw_c = img_ref[0].T                                # (HW, C): tiny XLU transpose
    snd_scaled = (feat * scale).astype(jnp.bfloat16)       # scale folded into small side
    z = jnp.dot(img_hw_c.astype(jnp.bfloat16), snd_scaled,
                preferred_element_type=jnp.float32)        # (HW, TN)
    pred_ref[0] = z + bias


def synthesizer_fused_forward(mag_mix, feat_img, sound_w, sound_b, scale, bias,
                              *, ft_tile_max=2048):
    # mag_mix: (B, 1, F, T); feat_img: (B, C, HW) from net_frame_forward
    B, _, Fdim, Tdim = mag_mix.shape
    FT = Fdim * Tdim
    _, C, HW = feat_img.shape
    TN = _pick_tile(FT, ft_tile_max)
    n_ft = FT // TN
    mag_flat = mag_mix.reshape(B, 1, FT)

    # Explicit VMEM budgeting (mag + snd + img + pred tiles, double-buffered),
    # so the chosen TN keeps double-buffering alive on v5e/v6e/v7x.
    tile_bytes = 4 * (TN + 2 * C * TN + C * HW + HW * TN)
    vmem_limit = int(min(112 * 2 ** 20, max(32 * 2 ** 20, 4 * tile_bytes)))

    pred, feat_sound = pl.pallas_call(
        _synth_kernel,
        out_shape=(jax.ShapeDtypeStruct((B, HW, FT), jnp.float32),
                   jax.ShapeDtypeStruct((B, C, FT), jnp.float32)),
        grid_spec=pltpu.PrefetchScalarGridSpec(
            num_scalar_prefetch=0,
            grid=(B, n_ft),
            in_specs=[
                pl.BlockSpec(memory_space=pltpu.MemorySpace.SMEM),      # scale
                pl.BlockSpec(memory_space=pltpu.MemorySpace.SMEM),      # bias
                pl.BlockSpec((1, 1, TN), lambda b_, f_: (b_, 0, f_)),   # mag tile
                pl.BlockSpec((C, 1), lambda b_, f_: (0, 0)),            # sound_w
                pl.BlockSpec((C, 1), lambda b_, f_: (0, 0)),            # sound_b
                pl.BlockSpec((1, C, HW), lambda b_, f_: (b_, 0, 0)),    # FT-invariant img
            ],
            out_specs=[
                pl.BlockSpec((1, HW, TN), lambda b_, f_: (b_, 0, f_)),  # pred
                pl.BlockSpec((1, C, TN), lambda b_, f_: (b_, 0, f_)),   # feat_sound
            ],
        ),
        compiler_params=pltpu.CompilerParams(
            dimension_semantics=("parallel", "parallel"),
            vmem_limit_bytes=vmem_limit,
        ),
    )(scale, bias, mag_flat, sound_w, sound_b, feat_img)
    return pred, feat_sound   # (B, HW, FT) f32, (B, C, FT) f32


# ---------------------------------------------------------------------------
# NetWrapper.forward equivalent
# ---------------------------------------------------------------------------
def net_wrapper_forward(params, batch_data, args):
    mags = batch_data['mag_mix']                      # (B, 1, F, T)
    frames = batch_data['frames']

    # TODO(synk): args.log_freq path (warpgrid + F.grid_sample bilinear
    # resample) has no clean Pallas equivalent; this eval runs log_freq=False.
    assert not args.log_freq

    B, _, Fdim, Tdim = mags.shape

    if args.img_pool:
        print('Evaluation requires pool argument == False !!')

    frames_tensor = frames[0]                         # (B, 3, Tf, H, W)
    _, _, Tf, H, W = frames_tensor.shape

    # feat_frames = activate(net_frame(frames, pool=False), 'sigmoid').mean(dim=2)
    feat_frames_flat = net_frame_forward(
        frames_tensor, params['frame_w'], params['frame_b'])      # (B, C, HW)
    feat_frames = feat_frames_flat.reshape(B, C_FEAT, H, W)       # no HBM transpose

    # feat_sound = activate(net_sound(log(mags + 1e-10)), 'no')   (fused below)
    # pred_masks = net_synthesizer.forward_pixelwise(feat_frames, feat_sound)
    pred_flat, feat_sound_flat = synthesizer_fused_forward(
        mags, feat_frames_flat, params['sound_w'], params['sound_b'],
        params['synth_scale'], params['synth_bias'])
    feat_sound = feat_sound_flat.reshape(B, C_FEAT, Fdim, Tdim)
    pred_masks = pred_flat.reshape(B, H, W, Fdim, Tdim)           # (B,H,W,F,T)

    return pred_masks, feat_frames, feat_sound


def init_params(key):
    k1, k2, k3, k4 = jax.random.split(key, 4)
    return {
        # net_sound: 1x1 conv, 1 -> C_FEAT channels
        'sound_w': 0.1 * jax.random.normal(k1, (C_FEAT, 1), jnp.float32),
        'sound_b': 0.1 * jax.random.normal(k2, (C_FEAT, 1), jnp.float32),
        # net_frame: per-pixel linear, 3 -> C_FEAT channels (channels-first)
        'frame_w': 0.1 * jax.random.normal(k3, (C_FEAT, 3), jnp.float32),
        'frame_b': 0.1 * jax.random.normal(k4, (C_FEAT, 1), jnp.float32),
        # InnerProd synthesizer: scale init ones(1), bias init zeros(1)
        'synth_scale': jnp.ones((1,), jnp.float32),
        'synth_bias': jnp.zeros((1,), jnp.float32),
    }


if __name__ == "__main__":
    B, Fdim, Tdim = 2, 64, 64      # spectrogram: (B, 1, Freq, Time); FT = 4096 -> 2 FT tiles
    Tf, H, W = 3, 8, 8             # video frames: (B, 3, Tf, H, W)

    key = jax.random.PRNGKey(0)
    kp, km, kf = jax.random.split(key, 3)

    params = init_params(kp)
    mag_mix = jax.random.uniform(km, (B, 1, Fdim, Tdim), jnp.float32,
                                 minval=0.0, maxval=1.0)
    frames0 = jax.random.normal(kf, (B, 3, Tf, H, W), jnp.float32)

    batch_data = {'mag_mix': mag_mix, 'frames': [frames0]}
    args = SimpleNamespace(log_freq=False, img_pool=False,
                           sound_activation='no', img_activation='sigmoid',
                           device='tpu')

    pred_masks, feat_frames, feat_sound = net_wrapper_forward(
        params, batch_data, args)
    jax.block_until_ready((pred_masks, feat_frames, feat_sound))

    assert pred_masks.shape == (B, H, W, Fdim, Tdim)
    assert feat_frames.shape == (B, C_FEAT, H, W)
    assert feat_sound.shape == (B, C_FEAT, Fdim, Tdim)
    assert bool(jnp.all(jnp.isfinite(pred_masks)))

    print("KERNEL_OK")
</pallas_src>

<mosaic_0001>
module attributes {stable_mosaic.version = 11 : i64} {
  func.func @_frame_kernel(%arg0: i32, %arg1: i32, %arg2: i32, %arg3: memref<1x1x3x64xf32, #tpu.memory_space<vmem>>, %arg4: memref<32x3xf32, #tpu.memory_space<vmem>>, %arg5: memref<32x1xf32, #tpu.memory_space<vmem>>, %arg6: memref<1x32x64xf32, #tpu.memory_space<vmem>>, %arg7: memref<32x64xf32, #tpu.memory_space<vmem>>) attributes {dimension_semantics = [#tpu.dimension_semantics<parallel>, #tpu.dimension_semantics<parallel>, #tpu.dimension_semantics<arbitrary>], iteration_bounds = array<i64: 2, 1, 3>, scalar_prefetch = 0 : i64, scratch_operands = 1 : i64, tpu.core_type = #tpu.core_type<tc>, window_params = [{transform_indices = @transform_0, window_bounds = array<i64: 1, 1, 3, 64>}, {pipeline_mode = #tpu.pipeline_mode<synchronous>, transform_indices = @transform_1, window_bounds = array<i64: 32, 3>}, {pipeline_mode = #tpu.pipeline_mode<synchronous>, transform_indices = @transform_2, window_bounds = array<i64: 32, 1>}, {transform_indices = @transform_3, window_bounds = array<i64: 1, 32, 64>}]} {
    %c0_i32 = arith.constant 0 : i32
    %0 = arith.cmpi eq, %arg2, %c0_i32 : i32
    %1 = arith.extui %0 : i1 to i32
    %c0_i32_0 = arith.constant 0 : i32
    %2 = arith.cmpi ne, %1, %c0_i32_0 : i32
    scf.if %2 {
      %cst_13 = arith.constant 0.000000e+00 : f32
      %37 = vector.broadcast %cst_13 : f32 to vector<32x64xf32>
      %c0_14 = arith.constant 0 : index
      %c0_15 = arith.constant 0 : index
      %38 = vector.load %arg7[%c0_14, %c0_15] : memref<32x64xf32, #tpu.memory_space<vmem>>, vector<32x64xf32>
      tpu.vector_store %arg7[%c0_14, %c0_15], %37 {strides = array<i32>} : memref<32x64xf32, #tpu.memory_space<vmem>>, vector<32x64xf32>,
    } else {
    }
    %c0 = arith.constant 0 : index
    %c0_1 = arith.constant 0 : index
    %c0_2 = arith.constant 0 : index
    %c0_3 = arith.constant 0 : index
    %3 = vector.load %arg3[%c0, %c0_1, %c0_2, %c0_3] : memref<1x1x3x64xf32, #tpu.memory_space<vmem>>, vector<1x1x3x64xf32>
    %4 = vector.shape_cast %3 : vector<1x1x3x64xf32> to vector<3x64xf32>
    %c0_4 = arith.constant 0 : index
    %c0_5 = arith.constant 0 : index
    %5 = vector.load %arg4[%c0_4, %c0_5] : memref<32x3xf32, #tpu.memory_space<vmem>>, vector<32x3xf32>
    %c0_6 = arith.constant 0 : index
    %c0_7 = arith.constant 0 : index
    %6 = vector.load %arg5[%c0_6, %c0_7] : memref<32x1xf32, #tpu.memory_space<vmem>>, vector<32x1xf32>
    %7 = vector.extract_strided_slice %5 {offsets = [0, 0], sizes = [32, 1], strides = [1, 1]} : vector<32x3xf32> to vector<32x1xf32>
    %8 = vector.extract_strided_slice %4 {offsets = [0, 0], sizes = [1, 64], strides = [1, 1]} : vector<3x64xf32> to vector<1x64xf32>
    %9 = vector.broadcast %7 : vector<32x1xf32> to vector<32x64xf32>
    %10 = vector.broadcast %8 : vector<1x64xf32> to vector<32x64xf32>
    %11 = arith.mulf %9, %10 : vector<32x64xf32>
    %12 = vector.broadcast %6 : vector<32x1xf32> to vector<32x64xf32>
    %13 = arith.addf %12, %11 : vector<32x64xf32>
    %14 = vector.extract_strided_slice %5 {offsets = [0, 1], sizes = [32, 1], strides = [1, 1]} : vector<32x3xf32> to vector<32x1xf32>
    %15 = vector.extract_strided_slice %4 {offsets = [1, 0], sizes = [1, 64], strides = [1, 1]} : vector<3x64xf32> to vector<1x64xf32>
    %16 = vector.broadcast %14 : vector<32x1xf32> to vector<32x64xf32>
    %17 = vector.broadcast %15 : vector<1x64xf32> to vector<32x64xf32>
    %18 = arith.mulf %16, %17 : vector<32x64xf32>
    %19 = arith.addf %13, %18 : vector<32x64xf32>
    %20 = vector.extract_strided_slice %5 {offsets = [0, 2], sizes = [32, 1], strides = [1, 1]} : vector<32x3xf32> to vector<32x1xf32>
    %21 = vector.extract_strided_slice %4 {offsets = [2, 0], sizes = [1, 64], strides = [1, 1]} : vector<3x64xf32> to vector<1x64xf32>
    %22 = vector.broadcast %20 : vector<32x1xf32> to vector<32x64xf32>
    %23 = vector.broadcast %21 : vector<1x64xf32> to vector<32x64xf32>
    %24 = arith.mulf %22, %23 : vector<32x64xf32>
    %25 = arith.addf %19, %24 : vector<32x64xf32>
    %c0_8 = arith.constant 0 : index
    %c0_9 = arith.constant 0 : index
    %26 = vector.load %arg7[%c0_8, %c0_9] : memref<32x64xf32, #tpu.memory_space<vmem>>, vector<32x64xf32>
    %27 = arith.negf %25 : vector<32x64xf32>
    %28 = math.exp %27 : vector<32x64xf32>
    %cst = arith.constant 1.000000e+00 : f32
    %29 = vector.broadcast %cst : f32 to vector<32x64xf32>
    %30 = arith.addf %29, %28 : vector<32x64xf32>
    %31 = arith.divf %29, %30 : vector<32x64xf32>
    %32 = arith.addf %26, %31 : vector<32x64xf32>
    %c0_10 = arith.constant 0 : index
    %c0_11 = arith.constant 0 : index
    %33 = vector.load %arg7[%c0_10, %c0_11] : memref<32x64xf32, #tpu.memory_space<vmem>>, vector<32x64xf32>
    tpu.vector_store %arg7[%c0_10, %c0_11], %32 {strides = array<i32>} : memref<32x64xf32, #tpu.memory_space<vmem>>, vector<32x64xf32>,
    %c2_i32 = arith.constant 2 : i32
    %34 = arith.cmpi eq, %arg2, %c2_i32 : i32
    %35 = arith.extui %34 : i1 to i32
    %c0_i32_12 = arith.constant 0 : i32
    %36 = arith.cmpi ne, %35, %c0_i32_12 : i32
    scf.if %36 {
      %c0_13 = arith.constant 0 : index
      %c0_14 = arith.constant 0 : index
      %37 = vector.load %arg7[%c0_13, %c0_14] : memref<32x64xf32, #tpu.memory_space<vmem>>, vector<32x64xf32>
      %cst_15 = arith.constant 3.000000e+00 : f32
      %38 = vector.broadcast %cst_15 : f32 to vector<32x64xf32>
      %39 = arith.divf %37, %38 : vector<32x64xf32>
      %c0_16 = arith.constant 0 : index
      %c0_17 = arith.constant 0 : index
      %c0_18 = arith.constant 0 : index
      %40 = vector.load %arg6[%c0_16, %c0_17, %c0_18] : memref<1x32x64xf32, #tpu.memory_space<vmem>>, vector<1x32x64xf32>
      %41 = vector.shape_cast %40 : vector<1x32x64xf32> to vector<32x64xf32>
      %42 = vector.shape_cast %39 : vector<32x64xf32> to vector<1x32x64xf32>
      tpu.vector_store %arg6[%c0_16, %c0_17, %c0_18], %42 {strides = array<i32>} : memref<1x32x64xf32, #tpu.memory_space<vmem>>, vector<1x32x64xf32>,
    } else {
    }
    return
  }
  func.func @transform_0(%arg0: i32, %arg1: i32, %arg2: i32) -> (i32, i32, i32, i32) {
    %c0_i32 = arith.constant 0 : i32
    %c0_i32_0 = arith.constant 0 : i32
    return %arg0, %arg2, %c0_i32, %arg1 : i32, i32, i32, i32
  }
  func.func @transform_1(%arg0: i32, %arg1: i32, %arg2: i32) -> (i32, i32) {
    %c0_i32 = arith.constant 0 : i32
    %c0_i32_0 = arith.constant 0 : i32
    %c0_i32_1 = arith.constant 0 : i32
    return %c0_i32, %c0_i32_0 : i32, i32
  }
  func.func @transform_2(%arg0: i32, %arg1: i32, %arg2: i32) -> (i32, i32) {
    %c0_i32 = arith.constant 0 : i32
    %c0_i32_0 = arith.constant 0 : i32
    %c0_i32_1 = arith.constant 0 : i32
    return %c0_i32, %c0_i32_0 : i32, i32
  }
  func.func @transform_3(%arg0: i32, %arg1: i32, %arg2: i32) -> (i32, i32, i32) {
    %c0_i32 = arith.constant 0 : i32
    %c0_i32_0 = arith.constant 0 : i32
    return %arg0, %c0_i32, %arg1 : i32, i32, i32
  }
}

</mosaic_0001>

<bundles_post_ra>
// kernel: tpu_custom_call.1
= control target key start
LH: loop header
LB: loop body
LE: loop exit
PB: predicated region body
PF: predicated region fallthrough
CT: control target
= control target key end

     0   :  { %8 = vsyncpa [#allocation4], 0  ;;  %s918_s0 = inlined_call_operand.vmem [shape: f32[2,3,3,64], index: 0, kind: input, shape index: {}]   ;;  %s919_s1 = inlined_call_operand.vmem [shape: f32[32,3], index: 1, kind: input, shape index: {}]   ;;  %s920_s2 = inlined_call_operand.vmem [shape: f32[32,1], index: 2, kind: input, shape index: {}]   ;;  %s921_s3 = inlined_call_operand.hbm [shape: f32[2,32,64], index: 3, kind: output, shape index: {}]  }
   0x1   :  { %10 = vsyncpa [#allocation4 + $0x1], 0  ;;  %s734_s12 = smov 0   ;;  %s736_s13 = smov 0  }
   0x2   :  { %s738_s14 = smov 0   ;;  %s740_s15 = smov 0  }
   0x3   :  { %s742_s16 = smov 0   ;;  %s744_s17 = smov 0  }
   0x4   :  { %s746_s18 = smov 0   ;;  %s748_s19 = smov 0  }
   0x5 LB: > { %s494_s20 = sadd.s32 4294967295, %s705_s19   ;;  %s495_s21 = sadd.s32 4294967294, %s705_s19   ;;  %s705_s19 = sphi %s748_s19, %s16_s19   ;;  %s701_s18 = sphi %s746_s18, %s930_s18   ;;  %s697_s17 = sphi %s744_s17, %s929_s17   ;;  %s693_s16 = sphi %s742_s16, %s928_s16   ;;  %s689_s15 = sphi %s740_s15, %s927_s15   ;;  %s685_s14 = sphi %s738_s14, %s926_s14   ;;  %s681_s13 = sphi %s736_s13, %s925_s13   ;;  %s677_s12 = sphi %s734_s12, %s924_s12  }
   0x6   : > { %s28_s22 = sadd.s32 1, %s697_s17  ;;  %s35_s23 = sadd.s32 1, %s701_s18 }
   0x7   : > { %p29_p0 = scmp.ge.s32.totalorder %s28_s22, 3  ;;  %p126_p1 = scmp.ne.s32.totalorder %s685_s14, %s681_s13 }
   0x8   : > { %p127_p2 = scmp.eq.s32.totalorder %s494_s20, 5  ;;  %p132_p4 = scmp.ne.s32.totalorder %s681_s13, %s677_s12 }
   0x9   : > { %s932_s22 = smov (%p29_p0, %s28_s22), 0  ;;  %s934_s23 = smov (!%p29_p0, %s35_s23), %s701_s18 }
   0xa   : > { %p783_p3 = por %p127_p2, %p126_p1  ;;  %p37_p5 = scmp.ge.s32.totalorder %s934_s23, 2 }
   0xb   : > { %p133_p6 = scmp.eq.s32.totalorder %s495_s21, 5  ;;  %p498_p7 = scmp.ge.s32.totalorder %s705_s19, 1 }
   0xc   : > { %p171_p8 = scmp.lt.s32.totalorder %s705_s19, 7  ;;  %s936_s23 = smov (%p37_p5, %s934_s23), 0 }
   0xd   : > { %p793_p9 = por %p133_p6, %p132_p4  ;;  %s111_s26 = ssub.s32 %s701_s18, %s936_s23 }
   0xe   : > { %p172_p10 = pnand %p498_p7, %p171_p8  ;;  %s116_s27 = sadd.s32 1, %s685_s14 }
   0xf   : > { %p114_p11 = scmp.eq.s32.totalorder %s111_s26, 0  ;;  %s198_s29 = sand.u32 (!%p172_p10), 1, %s681_s13  }
  0x10   : > { %175 = sbr.rel (%p172_p10) target bundleno = 265 (0x109), region = 32  ;;  %p201_p12 = scmp.lt.s32.totalorder (!%p172_p10), %s693_s16, 1 }
  0x11   : > { %s801_s28 = scalar_select %p114_p11, %s685_s14, %s116_s27  }
  0x12   : > { %s499_s30 = sshll.u32 (!%p172_p10), %s198_s29, 5  ;;  %p203_p13 = scmp.lt.s32.totalorder (!%p172_p10), %s689_s15, 2 }
  0x13   : > { %s815_s20 = scalar_lea.vmem (!%p172_p10), [#allocation3], %s499_s30  ;;  %p501_p0 = scmp.ne.s32.totalorder (!%p172_p10), %s689_s15, 0 }
  0x15   : > { %s202_s4 = scalar_select %p201_p12, %s693_s16, 1 }
  0x16   : > { %s204_s5 = scalar_select %p203_p13, %s689_s15, 2 }
  0x17   : > { %s513_s6 = smul.u32 3, %s202_s4 }
  0x18   : > { %215 = sbr.rel (%p501_p0) target bundleno = 32 (0x20), region = 36 }
  0x19   : > { %s209_s7 = sadd.s32 %s513_s6, %s204_s5 }
  0x1a   : > { %s500_s8 = sshll.u32 %s209_s7, 2 }
  0x1b   : > { %s813_s11 = scalar_lea.vmem %s918_s0, %s500_s8 }
  0x1d   : > { %vm216_vm0 = vcmask 523264   ;;  %v707_v0 = vmov 0.0  }
  0x1e   : > { %217 = vst.msk [vmem:[#allocation2] sm:$0xff] %vm216_vm0, %v707_v0  ;;  %218 = vst.msk [vmem:[#allocation2 + $0x8] sm:$0xff] %vm216_vm0, %v707_v0 }
  0x1f   : > { %219 = vst.msk [vmem:[#allocation2 + $0x10] sm:$0xff] %vm216_vm0, %v707_v0  ;;  %220 = vst.msk [vmem:[#allocation2 + $0x18] sm:$0xff] %vm216_vm0, %v707_v0 }
  0x20 PF: > { %v224_v1 = vld [vmem:[%s919_s1 + $0x10] sm:$0xff]  ;;  %v222_v2 = vld [vmem:[%s919_s1] sm:$0xff]  ;;  %v708_v3 = vmov 0   ;;  %v225_v4 = vld [vmem:[%s919_s1 + $0x18] sm:$0xff]  ;;  %v709_v10 = vmov 1   ;;  %v710_v11 = vmov 2   ;;  %v250_v16 = vlaneseq }
  0x21   : > { %592 = vset.pattern.permute.xlu1 %v708_v3  ;;  %591 = vset.pattern.permute.xlu0 %v708_v3  ;;  %v223_v5 = vld [vmem:[%s919_s1 + $0x8] sm:$0xff]  ;;  %v226_v7 = vld [vmem:[%s920_s2] sm:$0xff]  ;;  %v229_v8 = vld [vmem:[%s920_s2 + $0x18] sm:$0xff]  ;;  %vm370_vm1 = vcmask 523264   ;;  %p506_p1 = scmp.ne.s32.totalorder %s689_s15, 2 }
  0x22   : > { %242 = vperm.xlu1 %592, %v224_v1   ;;  %232 = vperm.xlu0 %591, %v222_v2   ;;  %v227_v6 = vld [vmem:[%s920_s2 + $0x8] sm:$0xff]  ;;  %v228_v9 = vld [vmem:[%s920_s2 + $0x10] sm:$0xff]  ;;  %v251_v19 = vshrl.u32 %v250_v16, 7  ;;  %v221_v24 = vld [vmem:[%s813_s11] sm:$0x7] }
  0x24   : > { %v252_v22 = vsub.s32 0, %v251_v19  ;;  %v300_v23 = vsub.s32 1, %v251_v19  ;;  %v328_v29 = vsub.s32 2, %v251_v19 }
  0x26   : > { %247 = vperm.xlu1 %592, %v225_v4   ;;  %237 = vperm.xlu0 %591, %v223_v5   ;;  %v253_v27 = vrot.slane %v221_v24, %v252_v22  ;;  %v301_v28 = vrot.slane %v221_v24, %v300_v23  ;;  %v329_v36 = vrot.slane %v221_v24, %v328_v29 }
  0x2a   : > { %265 = vperm.xlu1 %592, %v227_v6   ;;  %260 = vperm.xlu0 %591, %v226_v7  }
  0x2e   : > { %275 = vperm.xlu1 %592, %v229_v8   ;;  %270 = vperm.xlu0 %591, %v228_v9   ;;  %v338_v9 = vld [vmem:[#allocation2] sm:$0xff] }
  0x32   : > { %594 = vset.pattern.permute.xlu1 %v709_v10  ;;  %593 = vset.pattern.permute.xlu0 %v709_v10  ;;  %v339_v10 = vld [vmem:[#allocation2 + $0x8] sm:$0xff] }
  0x33   : > { %287 = vperm.xlu1 %594, %v223_v5   ;;  %283 = vperm.xlu0 %593, %v222_v2  }
  0x37   : > { %291 = vperm.xlu1 %594, %v224_v1   ;;  %295 = vperm.xlu0 %593, %v225_v4  }
  0x3b   : > { %595 = vset.pattern.permute.xlu1 %v710_v11  ;;  %596 = vset.pattern.permute.xlu0 %v710_v11 }
  0x3c   : > { %311 = vperm.xlu1 %595, %v222_v2   ;;  %315 = vperm.xlu0 %596, %v223_v5  }
  0x40   : > { %319 = vperm.xlu1 %595, %v224_v1  }
  0x44   : > { %323 = vperm.xlu1 %595, %v225_v4  }
  0x9d   : > { %v243_v12 = vpop.permute.xlu1 %242  ;;  %v233_v13 = vpop.permute.xlu0 %232 }
  0x9e   : > { %v254_v31 = vmul.f32 %v253_v27, %v233_v13  ;;  %v256_v39 = vmul.f32 %v253_v27, %v243_v12 }
  0xa1   : > { %v248_v14 = vpop.permute.xlu1 %247  ;;  %v238_v15 = vpop.permute.xlu0 %237 }
  0xa2   : > { %v255_v30 = vmul.f32 %v253_v27, %v238_v15  ;;  %v257_v50 = vmul.f32 %v253_v27, %v248_v14  ;;  %v340_v15 = vld [vmem:[#allocation2 + $0x10] sm:$0xff] }
  0xa5   : > { %v266_v17 = vpop.permute.xlu1 %265  ;;  %v261_v18 = vpop.permute.xlu0 %260 }
  0xa6   : > { %v279_v37 = vadd.f32 %v266_v17, %v255_v30  ;;  %v278_v38 = vadd.f32 %v261_v18, %v254_v31  ;;  %v341_v18 = vld [vmem:[#allocation2 + $0x18] sm:$0xff] }
  0xa9   : > { %v276_v20 = vpop.permute.xlu1 %275  ;;  %v271_v21 = vpop.permute.xlu0 %270 }
  0xaa   : > { %v280_v47 = vadd.f32 %v271_v21, %v256_v39  ;;  %v281_v57 = vadd.f32 %v276_v20, %v257_v50 }
  0xae   : > { %v288_v25 = vpop.permute.xlu1 %287  ;;  %v284_v26 = vpop.permute.xlu0 %283 }
  0xaf   : > { %v303_v34 = vmul.f32 %v301_v28, %v288_v25  ;;  %v302_v35 = vmul.f32 %v301_v28, %v284_v26 }
  0xb1   : > { %v307_v40 = vadd.f32 %v303_v34, %v279_v37  ;;  %v306_v43 = vadd.f32 %v302_v35, %v278_v38 }
  0xb2   : > { %v292_v32 = vpop.permute.xlu1 %291  ;;  %v296_v33 = vpop.permute.xlu0 %295 }
  0xb3   : > { %v304_v44 = vmul.f32 %v301_v28, %v292_v32  ;;  %v305_v51 = vmul.f32 %v301_v28, %v296_v33 }
  0xb5   : > { %v308_v53 = vadd.f32 %v304_v44, %v280_v47  ;;  %v309_v60 = vadd.f32 %v305_v51, %v281_v57 }
  0xb7   : > { %v312_v41 = vpop.permute.xlu1 %311  ;;  %v316_v42 = vpop.permute.xlu0 %315 }
  0xb8   : > { %v330_v45 = vmul.f32 %v329_v36, %v312_v41  ;;  %v331_v46 = vmul.f32 %v329_v36, %v316_v42 }
  0xba   : > { %v334_v48 = vadd.f32 %v330_v45, %v306_v43  ;;  %v335_v49 = vadd.f32 %v331_v46, %v307_v40 }
  0xbb   : > { %v320_v52 = vpop.permute.xlu1 %319 }
  0xbc   : > { %v502_v54 = vmul.f32 -1.442695, %v334_v48  ;;  %v503_v55 = vmul.f32 -1.442695, %v335_v49  ;;  %v332_v56 = vmul.f32 %v329_v36, %v320_v52 }
  0xbe   : > { %597 = vpow2.f32 %v502_v54  ;;  %v336_v58 = vadd.f32 %v332_v56, %v308_v53 }
  0xbf   : > { %599 = vpow2.f32 %v503_v55  ;;  %v324_v59 = vpop.permute.xlu1 %323 }
  0xc0   : > { %v504_v61 = vmul.f32 -1.442695, %v336_v58  ;;  %v333_v62 = vmul.f32 %v329_v36, %v324_v59 }
  0xc2   : > { %601 = vpow2.f32 %v504_v61  ;;  %v337_v63 = vadd.f32 %v333_v62, %v309_v60 }
  0xc4   : > { %v505_v0 = vmul.f32 -1.442695, %v337_v63 }
  0xc6   : > { %603 = vpow2.f32 %v505_v0 }
  0xcb   : > { %v598_v1 = vpop.eup %597 }
  0xcc   : > { %v600_v2 = vpop.eup %599  ;;  %v354_v3 = vadd.f32 1.0, %v598_v1 }
  0xcd   : > { %v355_v4 = vadd.f32 1.0, %v600_v2 }
  0xce   : > { %605 = vrcp.f32 %v354_v3 }
  0xcf   : > { %v602_v5 = vpop.eup %601  ;;  %607 = vrcp.f32 %v355_v4 }
  0xd0   : > { %v356_v6 = vadd.f32 1.0, %v602_v5 }
  0xd2   : > { %609 = vrcp.f32 %v356_v6 }
  0xd3   : > { %v604_v7 = vpop.eup %603 }
  0xd4   : > { %v357_v8 = vadd.f32 1.0, %v604_v7 }
  0xd6   : > { %611 = vrcp.f32 %v357_v8 }
  0xdb   : > { %v606_v11 = vpop.eup %605 }
  0xdc   : > { %v608_v12 = vpop.eup %607  ;;  %v366_v13 = vadd.f32 %v606_v11, %v338_v9 }
  0xdd   : > { %v367_v14 = vadd.f32 %v608_v12, %v339_v10 }
  0xde   : > { %371 = vst.msk [vmem:[#allocation2] sm:$0xff] %vm370_vm1, %v366_v13 }
  0xdf   : > { %v610_v16 = vpop.eup %609  ;;  %372 = vst.msk [vmem:[#allocation2 + $0x8] sm:$0xff] %vm370_vm1, %v367_v14 }
  0xe0   : > { %v368_v17 = vadd.f32 %v610_v16, %v340_v15 }
  0xe2   : > { %373 = vst.msk [vmem:[#allocation2 + $0x10] sm:$0xff] %vm370_vm1, %v368_v17  ;;  %378 = sbr.rel (%p506_p1) target bundleno = 241 (0xf1), region = 40 }
  0xe3   : > { %v612_v19 = vpop.eup %611 }
  0xe4   : > { %v369_v20 = vadd.f32 %v612_v19, %v341_v18 }
  0xe6   : > { %374 = vst.msk [vmem:[#allocation2 + $0x18] sm:$0xff] %vm370_vm1, %v369_v20 }
  0xe7   : > { %v379_v21 = vld [vmem:[#allocation2] sm:$0xff]  ;;  %v380_v22 = vld [vmem:[#allocation2 + $0x8] sm:$0xff] }
  0xe8   : > { %v384_v24 = vmul.f32 0.33333334, %v379_v21  ;;  %v385_v25 = vmul.f32 0.33333334, %v380_v22 }
  0xe9   : > { %v381_v23 = vld [vmem:[#allocation2 + $0x10] sm:$0xff] }
  0xea   : > { %v386_v26 = vmul.f32 0.33333334, %v381_v23  ;;  %388 = vst.msk [vmem:[%s815_s20] sm:$0xff] %vm370_vm1, %v384_v24  ;;  %389 = vst.msk [vmem:[%s815_s20 + $0x8] sm:$0xff] %vm370_vm1, %v385_v25 }
  0xec   : > { %390 = vst.msk [vmem:[%s815_s20 + $0x10] sm:$0xff] %vm370_vm1, %v386_v26 }
  0xed   : > { %v382_v27 = vld [vmem:[#allocation2 + $0x18] sm:$0xff] }
  0xee   : > { %v387_v28 = vmul.f32 0.33333334, %v382_v27 }
  0xf0   : > { %391 = vst.msk [vmem:[%s815_s20 + $0x18] sm:$0xff] %vm370_vm1, %v387_v28 }
  0xf1 PF: > { %s512_s15 = sshll.u32 %s693_s16, 9  ;;  %s407_s7 = sshll.u32 %s815_s20, 4  ;;  %s863_s7 = int_to_ptr.vmem [resolvable:$true] %s407_s7 }
  0xf2   : > { %s860_s6 = scalar_lea.hbm %s921_s3, %s512_s15  ;;  %s867_s8 = scalar_lea.sflag [#allocation4], %s198_s29 }
  0xf3   : > { %s613_s9 = scalar_lea.vmem %s863_s7, 512  ;;  %s711_s16 = smov [#allocation3]  }
  0xf4   : > { %p614_p2 = scmp.ne.s32.totalorder %s863_s7, %s613_s9  ;;  %s617_s10 = sshll.u32 %s711_s16, 4  ;;  %s618_s10 = int_to_ptr.vmem [resolvable:$false] %s617_s10 }
  0xf5   : > { %s619_s21 = scalar_lea.vmem %s618_s10, 1024  ;;  %p620_p6 = scmp.lt.s32.totalorder %s863_s7, %s618_s10 }
  0xf6   : > { %p615_p4 = pnand %p614_p2, %p783_p3  ;;  %p621_p7 = scmp.lt.s32.totalorder %s619_s21, %s613_s9 }
  0xf8   : > { %p616_p5 = pneg %p615_p4  ;;  %p622_p8 = por %p621_p7, %p620_p6 }
  0xfa   : > { %p623_p10 = pnand %p622_p8, %p616_p5 }
  0xfc   : > { %626 = shalt.err (!%p623_p10)
}
  0xfd   : > { %s627_s29 = scalar_lea.hbm %s860_s6, 512  ;;  %s631_s27 = scalar_lea.hbm %s921_s3, 1024 }
  0xfe   : > { %p628_p11 = scmp.ne.s32.totalorder %s860_s6, %s627_s29  ;;  %p632_p0 = scmp.lt.s32.totalorder %s860_s6, %s921_s3 }
  0xff   : > { %p633_p1 = scmp.lt.s32.totalorder %s631_s27, %s627_s29 }
 0x100   : > { %p629_p12 = pnand %p628_p11, %p783_p3 }
 0x101   : > { %p634_p2 = por %p633_p1, %p632_p0 }
 0x102   : > { %p630_p13 = pneg %p629_p12 }
 0x104   : > { %p635_p4 = pnand %p634_p2, %p630_p13 }
 0x106   : > { %638 = shalt.err (!%p635_p4)
}
 0x107   : > { %s712_s15 = smov 128   ;;  %s713_s11 = smov 8  }
 0x108   : > { %514 = dma.vmem_to_hbm [thread:$0]  (%p783_p3), %s863_s7, 512, %s860_s6, %s867_s8, %s712_s15, %s712_s15, %s713_s11  }
 0x109 PF: > { %p520_p5 = scmp.ge.s32.totalorder %s705_s19, 2  ;;  %s422_s5 = sand.u32 1, %s677_s12  }
 0x10a   : > { %s423_s9 = scalar_lea.sflag [#allocation4], %s422_s5 }
 0x10b   : > { %p517_p6 = pnand %p520_p5, %p793_p9 }
 0x10d   : > { %p518_p7 = pneg %p517_p6 }
 0x10f   : > { %672 = dma.done.wait (%p518_p7), %s423_s9, 512  }
 0x110   : > { %674 = vsyncadd (%p518_p7), %s423_s9, 4294966784  ;;  %s16_s19 = sadd.s32 1, %s705_s19   ;;  %s924_s12 = smov %s681_s13 }
 0x111   : > { %p13_p8 = scmp.ge.s32.totalorder %s16_s19, 8   ;;  %s925_s13 = smov %s685_s14 }
 0x112   : > { %s926_s14 = smov %s801_s28  ;;  %s927_s15 = smov %s697_s17 }
 0x113   : > { %s928_s16 = smov %s701_s18  ;;  %s929_s17 = smov %s932_s22 }
 0x114   : > { %s930_s18 = smov %s936_s23  ;;  %15 = sbr.rel (!%p13_p8) target bundleno = 5 (0x5), region = 75 }
 0x119   :  { %428 = vsyncpa [#allocation4], 1 }
 0x11a   :  { %430 = vsyncpa [#allocation4 + $0x1], 1 }

</bundles_post_ra>
